<compile_context>
chip_gen: v5e
topology: v5e:2x2
jax: 0.10.0
libtpu: 0.0.40
codegen_flags: <defaults>
</compile_context>

<pallas_src>
import functools

import jax
import jax.numpy as jnp
from jax import lax
from jax.experimental import pallas as pl
from jax.experimental.pallas import tpu as pltpu


def _round_up(x, m):
    return ((x + m - 1) // m) * m


def _ce_center_kernel(labels_sref,                 # scalar-prefetch: (B_pad,) int32 in SMEM
                      label_ref,                   # (TB, 1) int32 (VMEM)
                      logits_ref,                  # (TB, TC) float
                      feat_ref,                    # (TB, D) float (resident over class axis)
                      w_hbm,                       # (C, D) float, HBM (pl.ANY)
                      ce_rows_ref,                 # out: (TB, 1) f32  (lse - picked)
                      sq_rows_ref,                 # out: (TB, 1) f32  (row squared dist)
                      centers_buf,                 # scratch: (TB, D) f32
                      gather_sem,                  # scratch: DMA sems (TB,)
                      m_scr, l_scr, picked_scr,    # scratch: (TB, 1) f32 each
                      *, num_classes, block_b, block_c):
    i = pl.program_id(0)            # batch-tile index   ("parallel")
    k = pl.program_id(1)            # class-tile index   ("arbitrary", reduction, last)
    nk = pl.num_programs(1)

    @pl.when(k == 0)
    def _start_tile():
        # Kick off the row gather W[label[b]] for this batch tile; these DMAs
        # complete while the class loop below runs (gather hidden behind CE).
        @pl.loop(0, block_b)
        def _issue(r):
            lab = labels_sref[i * block_b + r]
            pltpu.make_async_copy(w_hbm.at[lab], centers_buf.at[r],
                                  gather_sem.at[r]).start()

        m_scr[...] = jnp.full((block_b, 1), -jnp.inf, dtype=jnp.float32)
        l_scr[...] = jnp.zeros((block_b, 1), dtype=jnp.float32)
        picked_scr[...] = jnp.zeros((block_b, 1), dtype=jnp.float32)

    # ---- online logsumexp over the class axis (flash-style) ----
    logits = logits_ref[...].astype(jnp.float32)                       # (TB, TC)
    lab_col = label_ref[...]                                           # (TB, 1) int32
    col = lax.broadcasted_iota(jnp.int32, logits.shape, 1) + k * block_c

    if num_classes % block_c == 0:
        masked = logits                                                # no padded classes
    else:
        masked = jnp.where(col < num_classes, logits, -jnp.inf)        # mask edge tile

    m_prev = m_scr[...]
    m_new = jnp.maximum(m_prev, jnp.max(masked, axis=-1, keepdims=True))
    l_scr[...] = (l_scr[...] * jnp.exp(m_prev - m_new)
                  + jnp.sum(jnp.exp(masked - m_new), axis=-1, keepdims=True))
    m_scr[...] = m_new
    # Picked logit: label never lands in a padded (>=C) column, so use raw logits.
    picked_scr[...] = picked_scr[...] + jnp.sum(
        jnp.where(col == lab_col, logits, 0.0), axis=-1, keepdims=True)

    @pl.when(k == nk - 1)
    def _finish_tile():
        # per-row cross-entropy contribution: logsumexp - picked logit
        ce_rows_ref[...] = m_scr[...] + jnp.log(l_scr[...]) - picked_scr[...]

        # wait for the gathered centers, then per-row squared distance
        @pl.loop(0, block_b)
        def _wait(r):
            pltpu.make_async_copy(w_hbm.at[0], centers_buf.at[r],
                                  gather_sem.at[r]).wait()
        diff = feat_ref[...].astype(jnp.float32) - centers_buf[...]
        sq_rows_ref[...] = jnp.sum(diff * diff, axis=-1, keepdims=True)


def cross_entropy_center_loss(logits, feat_fusion, label, center_weight,
                              *, lambda_c=1.0, lambda_total=0.5,
                              block_b=None, block_c=None):
    """Returns (total_loss_scalar, logits) matching the PyTorch module forward."""
    B, C = logits.shape
    D = feat_fusion.shape[-1]
    assert center_weight.shape == (C, D)

    # ---- tile selection ----
    if block_b is None:
        block_b = min(256, B)
    block_b = _round_up(max(int(block_b), 1), 8)            # sublane multiple
    b_pad = _round_up(B, block_b)
    n_b = b_pad // block_b

    if block_c is None:
        block_c = C if C <= 2048 else 1024
    block_c = int(block_c)
    if block_c >= C:
        block_c = C                                          # full-dim block (always legal)
    elif block_c % 128 != 0:
        block_c = max(128, (block_c // 128) * 128)           # lane multiple
    n_c = pl.cdiv(C, block_c)

    # ---- inputs: only labels need padding (cheap); logits/feat use partial edge blocks ----
    labels = label.astype(jnp.int32).reshape(-1)
    if b_pad != B:
        labels = jnp.pad(labels, (0, b_pad - B))             # pad with class 0 (valid gather idx)
    label_col = labels.reshape(b_pad, 1)

    kernel = functools.partial(
        _ce_center_kernel,
        num_classes=C, block_b=block_b, block_c=block_c)

    grid_spec = pltpu.PrefetchScalarGridSpec(
        num_scalar_prefetch=1,
        grid=(n_b, n_c),
        in_specs=[
            pl.BlockSpec((block_b, 1), lambda i, k, lab: (i, 0)),         # label column
            pl.BlockSpec((block_b, block_c), lambda i, k, lab: (i, k)),   # logits tile
            pl.BlockSpec((block_b, D), lambda i, k, lab: (i, 0)),         # feat tile (resident over k)
            pl.BlockSpec(memory_space=pl.ANY),                            # center weight stays in HBM
        ],
        out_specs=[
            pl.BlockSpec((block_b, 1), lambda i, k, lab: (i, 0)),         # per-row CE partial
            pl.BlockSpec((block_b, 1), lambda i, k, lab: (i, 0)),         # per-row squared dist
        ],
        scratch_shapes=[
            pltpu.VMEM((block_b, D), jnp.float32),    # gathered centers
            pltpu.SemaphoreType.DMA((block_b,)),      # per-row gather semaphores
            pltpu.VMEM((block_b, 1), jnp.float32),    # running max
            pltpu.VMEM((block_b, 1), jnp.float32),    # running sum-exp
            pltpu.VMEM((block_b, 1), jnp.float32),    # picked logits
        ],
    )

    # VMEM budget sized to the chosen tiles (double-buffered logits dominate).
    vmem_bytes = 4 * (2 * block_b * block_c + 3 * block_b * D + 32 * block_b) + (1 << 20)
    vmem_limit = int(min(max(2 * vmem_bytes, 4 << 20), 64 << 20))

    cost = pl.CostEstimate(
        flops=int(6 * b_pad * C + 4 * b_pad * D),
        transcendentals=int(b_pad * C + b_pad),
        bytes_accessed=int(4 * (B * C + 2 * B * D + 4 * b_pad)),
    )

    ce_rows, sq_rows = pl.pallas_call(
        kernel,
        grid_spec=grid_spec,
        out_shape=(jax.ShapeDtypeStruct((b_pad, 1), jnp.float32),
                   jax.ShapeDtypeStruct((b_pad, 1), jnp.float32)),
        compiler_params=pltpu.CompilerParams(
            dimension_semantics=("parallel", "arbitrary"),
            vmem_limit_bytes=vmem_limit),
        cost_estimate=cost,
    )(labels, label_col, logits, feat_fusion, center_weight)

    # Trivial O(B) epilogue in plain JAX (divisors use the TRUE batch size, not the padded one).
    ce_loss = jnp.sum(ce_rows[:B, 0]) / B
    dist = jnp.sqrt(jnp.sum(sq_rows[:B, 0]))
    c_loss = lambda_c / 2.0 / B * dist
    total = lambda_total * ce_loss + (1.0 - lambda_total) * c_loss
    return total, logits


def _reference(logits, feat, label, weight, lambda_c, lambda_total):
    # plain-JAX reference of the same math, for a silent sanity check
    B = logits.shape[0]
    lse = jax.scipy.special.logsumexp(logits, axis=-1)
    picked = jnp.take_along_axis(logits, label[:, None], axis=-1)[:, 0]
    ce = jnp.mean(lse - picked)
    centers = weight[label]
    dist = jnp.sqrt(jnp.sum((feat - centers) ** 2))
    c = lambda_c / 2.0 / B * dist
    return lambda_total * ce + (1.0 - lambda_total) * c


if __name__ == "__main__":
    # Small shapes consistent with the module (logits (B, num_classes), feat (B, feat_dim)).
    # Exercises batch tiling + padding (20 -> 24) and class tiling + edge masking
    # (400 classes with 128-wide class tiles), plus the single-class-tile path.
    B, NUM_CLASSES, FEAT_DIM = 20, 400, 32
    LAMBDA_C, LAMBDA_TOTAL = 1.0, 0.5

    key = jax.random.PRNGKey(0)
    k_logits, k_feat, k_w, k_lab = jax.random.split(key, 4)

    logits = jax.random.normal(k_logits, (B, NUM_CLASSES), dtype=jnp.float32)
    feat_fusion = jax.random.normal(k_feat, (B, FEAT_DIM), dtype=jnp.float32)
    # nn.Parameter(torch.randn(num_classes, feat_dim)) -> deterministic normal init
    center_weight = jax.random.normal(k_w, (NUM_CLASSES, FEAT_DIM), dtype=jnp.float32)
    label = jax.random.randint(k_lab, (B,), 0, NUM_CLASSES, dtype=jnp.int32)

    ref = _reference(logits, feat_fusion, label, center_weight, LAMBDA_C, LAMBDA_TOTAL)

    # Config 1: multi-tile (batch padded, class tiled with edge masking).
    total_loss, logits_out = cross_entropy_center_loss(
        logits, feat_fusion, label, center_weight,
        lambda_c=LAMBDA_C, lambda_total=LAMBDA_TOTAL,
        block_b=8, block_c=128,
    )
    total_loss = jax.block_until_ready(total_loss)
    jax.block_until_ready(logits_out)
    assert jnp.allclose(total_loss, ref, rtol=1e-5, atol=1e-5), (total_loss, ref)
    assert logits_out.shape == (B, NUM_CLASSES)

    # Config 2: default tiling (single class tile, single batch tile).
    total_loss2, _ = cross_entropy_center_loss(
        logits, feat_fusion, label, center_weight,
        lambda_c=LAMBDA_C, lambda_total=LAMBDA_TOTAL,
    )
    total_loss2 = jax.block_until_ready(total_loss2)
    assert jnp.allclose(total_loss2, ref, rtol=1e-5, atol=1e-5), (total_loss2, ref)

    print("KERNEL_OK")
</pallas_src>

<mosaic_0001>
module attributes {stable_mosaic.version = 11 : i64} {
  func.func @_ce_center_kernel(%arg0: i32, %arg1: i32, %arg2: memref<24xi32, #tpu.memory_space<smem>>, %arg3: memref<8x1xi32, #tpu.memory_space<vmem>>, %arg4: memref<8x128xf32, #tpu.memory_space<vmem>>, %arg5: memref<8x32xf32, #tpu.memory_space<vmem>>, %arg6: memref<400x32xf32, #tpu.memory_space<any>>, %arg7: memref<8x1xf32, #tpu.memory_space<vmem>>, %arg8: memref<8x1xf32, #tpu.memory_space<vmem>>, %arg9: memref<8x32xf32, #tpu.memory_space<vmem>>, %arg10: memref<8x!tpu.dma_semaphore, #tpu.memory_space<semaphore_mem>>, %arg11: memref<8x1xf32, #tpu.memory_space<vmem>>, %arg12: memref<8x1xf32, #tpu.memory_space<vmem>>, %arg13: memref<8x1xf32, #tpu.memory_space<vmem>>) attributes {dimension_semantics = [#tpu.dimension_semantics<parallel>, #tpu.dimension_semantics<arbitrary>], iteration_bounds = array<i64: 3, 4>, scalar_prefetch = 1 : i64, scratch_operands = 5 : i64, tpu.core_type = #tpu.core_type<tc>, window_params = [{transform_indices = @transform_0, window_bounds = array<i64: 8, 1>}, {transform_indices = @transform_1, window_bounds = array<i64: 8, 128>}, {transform_indices = @transform_2, window_bounds = array<i64: 8, 32>}, {}, {transform_indices = @transform_4, window_bounds = array<i64: 8, 1>}, {transform_indices = @transform_5, window_bounds = array<i64: 8, 1>}]} {
    %c0_i32 = arith.constant 0 : i32
    %0 = arith.cmpi eq, %arg1, %c0_i32 : i32
    %1 = arith.extui %0 : i1 to i32
    %c0_i32_0 = arith.constant 0 : i32
    %2 = arith.cmpi ne, %1, %c0_i32_0 : i32
    scf.if %2 {
      %c0_i32_21 = arith.constant 0 : i32
      %c8_i32 = arith.constant 8 : i32
      %41 = arith.addi %c0_i32_21, %c8_i32 : i32
      %c1_i32 = arith.constant 1 : i32
      scf.for %arg14 = %c0_i32_21 to %41 step %c1_i32  : i32 {
        %c1_i32_32 = arith.constant 1 : i32
        %48 = arith.muli %arg14, %c1_i32_32 : i32
        %c0_i32_33 = arith.constant 0 : i32
        %49 = arith.addi %c0_i32_33, %48 : i32
        %c8_i32_34 = arith.constant 8 : i32
        %50 = arith.muli %arg0, %c8_i32_34 : i32
        %51 = arith.addi %50, %49 : i32
        %52 = arith.index_cast %51 : i32 to index
        %53 = memref.load %arg2[%52] : memref<24xi32, #tpu.memory_space<smem>>
        %c0_i32_35 = arith.constant 0 : i32
        %54 = tpu.memref_slice %arg6[%53, %c0_i32_35] : memref<400x32xf32, #tpu.memory_space<any>> -> memref<1x32xf32, #tpu.memory_space<any>>
        %55 = tpu.memref_squeeze %54 : memref<1x32xf32, #tpu.memory_space<any>> -> memref<32xf32, #tpu.memory_space<any>>
        %c0_i32_36 = arith.constant 0 : i32
        %56 = tpu.memref_slice %arg9[%49, %c0_i32_36] : memref<8x32xf32, #tpu.memory_space<vmem>> -> memref<1x32xf32, #tpu.memory_space<vmem>>
        %57 = tpu.memref_squeeze %56 : memref<1x32xf32, #tpu.memory_space<vmem>> -> memref<32xf32, #tpu.memory_space<vmem>>
        %58 = tpu.memref_slice %arg10[%49] : memref<8x!tpu.dma_semaphore, #tpu.memory_space<semaphore_mem>> -> memref<1x!tpu.dma_semaphore, #tpu.memory_space<semaphore_mem>>
        %59 = tpu.memref_squeeze %58 : memref<1x!tpu.dma_semaphore, #tpu.memory_space<semaphore_mem>> -> memref<!tpu.dma_semaphore, #tpu.memory_space<semaphore_mem>>
        tpu.enqueue_dma source(%55 : memref<32xf32, #tpu.memory_space<any>>) target(%57 : memref<32xf32, #tpu.memory_space<vmem>>) target_semaphore(%59 : memref<!tpu.dma_semaphore, #tpu.memory_space<semaphore_mem>>)
      }
      %c8_i32_22 = arith.constant 8 : i32
      %cst_23 = arith.constant 0xFF800000 : f32
      %42 = vector.broadcast %cst_23 : f32 to vector<8x1xf32>
      %c0_24 = arith.constant 0 : index
      %c0_25 = arith.constant 0 : index
      %43 = vector.load %arg11[%c0_24, %c0_25] : memref<8x1xf32, #tpu.memory_space<vmem>>, vector<8x1xf32>
      tpu.vector_store %arg11[%c0_24, %c0_25], %42 {strides = array<i32>} : memref<8x1xf32, #tpu.memory_space<vmem>>, vector<8x1xf32>,
      %cst_26 = arith.constant 0.000000e+00 : f32
      %44 = vector.broadcast %cst_26 : f32 to vector<8x1xf32>
      %c0_27 = arith.constant 0 : index
      %c0_28 = arith.constant 0 : index
      %45 = vector.load %arg12[%c0_27, %c0_28] : memref<8x1xf32, #tpu.memory_space<vmem>>, vector<8x1xf32>
      tpu.vector_store %arg12[%c0_27, %c0_28], %44 {strides = array<i32>} : memref<8x1xf32, #tpu.memory_space<vmem>>, vector<8x1xf32>,
      %cst_29 = arith.constant 0.000000e+00 : f32
      %46 = vector.broadcast %cst_29 : f32 to vector<8x1xf32>
      %c0_30 = arith.constant 0 : index
      %c0_31 = arith.constant 0 : index
      %47 = vector.load %arg13[%c0_30, %c0_31] : memref<8x1xf32, #tpu.memory_space<vmem>>, vector<8x1xf32>
      tpu.vector_store %arg13[%c0_30, %c0_31], %46 {strides = array<i32>} : memref<8x1xf32, #tpu.memory_space<vmem>>, vector<8x1xf32>,
    } else {
    }
    %c0 = arith.constant 0 : index
    %c0_1 = arith.constant 0 : index
    %3 = vector.load %arg4[%c0, %c0_1] : memref<8x128xf32, #tpu.memory_space<vmem>>, vector<8x128xf32>
    %c0_2 = arith.constant 0 : index
    %c0_3 = arith.constant 0 : index
    %4 = vector.load %arg3[%c0_2, %c0_3] : memref<8x1xi32, #tpu.memory_space<vmem>>, vector<8x1xi32>
    %5 = tpu.iota {dimensions = array<i32: 1>} : vector<8x128xi32>
    %c128_i32 = arith.constant 128 : i32
    %6 = arith.muli %arg1, %c128_i32 : i32
    %7 = vector.broadcast %6 : i32 to vector<8x128xi32>
    %8 = arith.addi %5, %7 : vector<8x128xi32>
    %c400_i32 = arith.constant 400 : i32
    %9 = vector.broadcast %c400_i32 : i32 to vector<8x128xi32>
    %10 = arith.cmpi slt, %8, %9 : vector<8x128xi32>
    %cst = arith.constant 0xFF800000 : f32
    %11 = vector.broadcast %cst : f32 to vector<8x128xf32>
    %12 = arith.select %10, %3, %11 : vector<8x128xi1>, vector<8x128xf32>
    %c0_4 = arith.constant 0 : index
    %c0_5 = arith.constant 0 : index
    %13 = vector.load %arg11[%c0_4, %c0_5] : memref<8x1xf32, #tpu.memory_space<vmem>>, vector<8x1xf32>
    %cst_6 = arith.constant dense<0xFF800000> : vector<8xf32>
    %14 = vector.multi_reduction <maximumf>, %12, %cst_6 [1] : vector<8x128xf32> to vector<8xf32>
    %15 = vector.shape_cast %14 : vector<8xf32> to vector<8x1xf32>
    %16 = arith.maximumf %13, %15 : vector<8x1xf32>
    %c0_7 = arith.constant 0 : index
    %c0_8 = arith.constant 0 : index
    %17 = vector.load %arg12[%c0_7, %c0_8] : memref<8x1xf32, #tpu.memory_space<vmem>>, vector<8x1xf32>
    %18 = arith.subf %13, %16 : vector<8x1xf32>
    %19 = math.exp %18 : vector<8x1xf32>
    %20 = arith.mulf %17, %19 : vector<8x1xf32>
    %21 = vector.broadcast %16 : vector<8x1xf32> to vector<8x128xf32>
    %22 = arith.subf %12, %21 : vector<8x128xf32>
    %23 = math.exp %22 : vector<8x128xf32>
    %cst_9 = arith.constant dense<0.000000e+00> : vector<8xf32>
    %24 = vector.multi_reduction <add>, %23, %cst_9 [1] : vector<8x128xf32> to vector<8xf32>
    %25 = vector.shape_cast %24 : vector<8xf32> to vector<8x1xf32>
    %26 = arith.addf %20, %25 : vector<8x1xf32>
    %c0_10 = arith.constant 0 : index
    %c0_11 = arith.constant 0 : index
    %27 = vector.load %arg12[%c0_10, %c0_11] : memref<8x1xf32, #tpu.memory_space<vmem>>, vector<8x1xf32>
    tpu.vector_store %arg12[%c0_10, %c0_11], %26 {strides = array<i32>} : memref<8x1xf32, #tpu.memory_space<vmem>>, vector<8x1xf32>,
    %c0_12 = arith.constant 0 : index
    %c0_13 = arith.constant 0 : index
    %28 = vector.load %arg11[%c0_12, %c0_13] : memref<8x1xf32, #tpu.memory_space<vmem>>, vector<8x1xf32>
    tpu.vector_store %arg11[%c0_12, %c0_13], %16 {strides = array<i32>} : memref<8x1xf32, #tpu.memory_space<vmem>>, vector<8x1xf32>,
    %c0_14 = arith.constant 0 : index
    %c0_15 = arith.constant 0 : index
    %29 = vector.load %arg13[%c0_14, %c0_15] : memref<8x1xf32, #tpu.memory_space<vmem>>, vector<8x1xf32>
    %30 = vector.broadcast %4 : vector<8x1xi32> to vector<8x128xi32>
    %31 = arith.cmpi eq, %8, %30 : vector<8x128xi32>
    %cst_16 = arith.constant 0.000000e+00 : f32
    %32 = vector.broadcast %cst_16 : f32 to vector<8x128xf32>
    %33 = arith.select %31, %3, %32 : vector<8x128xi1>, vector<8x128xf32>
    %cst_17 = arith.constant dense<0.000000e+00> : vector<8xf32>
    %34 = vector.multi_reduction <add>, %33, %cst_17 [1] : vector<8x128xf32> to vector<8xf32>
    %35 = vector.shape_cast %34 : vector<8xf32> to vector<8x1xf32>
    %36 = arith.addf %29, %35 : vector<8x1xf32>
    %c0_18 = arith.constant 0 : index
    %c0_19 = arith.constant 0 : index
    %37 = vector.load %arg13[%c0_18, %c0_19] : memref<8x1xf32, #tpu.memory_space<vmem>>, vector<8x1xf32>
    tpu.vector_store %arg13[%c0_18, %c0_19], %36 {strides = array<i32>} : memref<8x1xf32, #tpu.memory_space<vmem>>, vector<8x1xf32>,
    %c3_i32 = arith.constant 3 : i32
    %38 = arith.cmpi eq, %arg1, %c3_i32 : i32
    %39 = arith.extui %38 : i1 to i32
    %c0_i32_20 = arith.constant 0 : i32
    %40 = arith.cmpi ne, %39, %c0_i32_20 : i32
    scf.if %40 {
      %c0_21 = arith.constant 0 : index
      %c0_22 = arith.constant 0 : index
      %41 = vector.load %arg11[%c0_21, %c0_22] : memref<8x1xf32, #tpu.memory_space<vmem>>, vector<8x1xf32>
      %c0_23 = arith.constant 0 : index
      %c0_24 = arith.constant 0 : index
      %42 = vector.load %arg12[%c0_23, %c0_24] : memref<8x1xf32, #tpu.memory_space<vmem>>, vector<8x1xf32>
      %43 = math.log %42 : vector<8x1xf32>
      %44 = arith.addf %41, %43 : vector<8x1xf32>
      %c0_25 = arith.constant 0 : index
      %c0_26 = arith.constant 0 : index
      %45 = vector.load %arg13[%c0_25, %c0_26] : memref<8x1xf32, #tpu.memory_space<vmem>>, vector<8x1xf32>
      %46 = arith.subf %44, %45 : vector<8x1xf32>
      %c0_27 = arith.constant 0 : index
      %c0_28 = arith.constant 0 : index
      %47 = vector.load %arg7[%c0_27, %c0_28] : memref<8x1xf32, #tpu.memory_space<vmem>>, vector<8x1xf32>
      tpu.vector_store %arg7[%c0_27, %c0_28], %46 {strides = array<i32>} : memref<8x1xf32, #tpu.memory_space<vmem>>, vector<8x1xf32>,
      %c0_i32_29 = arith.constant 0 : i32
      %c8_i32 = arith.constant 8 : i32
      %48 = arith.addi %c0_i32_29, %c8_i32 : i32
      %c1_i32 = arith.constant 1 : i32
      scf.for %arg14 = %c0_i32_29 to %48 step %c1_i32  : i32 {
        %c1_i32_38 = arith.constant 1 : i32
        %56 = arith.muli %arg14, %c1_i32_38 : i32
        %c0_i32_39 = arith.constant 0 : i32
        %57 = arith.addi %c0_i32_39, %56 : i32
        %c0_i32_40 = arith.constant 0 : i32
        %c0_i32_41 = arith.constant 0 : i32
        %58 = tpu.memref_slice %arg6[%c0_i32_40, %c0_i32_41] : memref<400x32xf32, #tpu.memory_space<any>> -> memref<1x32xf32, #tpu.memory_space<any>>
        %59 = tpu.memref_squeeze %58 : memref<1x32xf32, #tpu.memory_space<any>> -> memref<32xf32, #tpu.memory_space<any>>
        %c0_i32_42 = arith.constant 0 : i32
        %60 = tpu.memref_slice %arg9[%57, %c0_i32_42] : memref<8x32xf32, #tpu.memory_space<vmem>> -> memref<1x32xf32, #tpu.memory_space<vmem>>
        %61 = tpu.memref_squeeze %60 : memref<1x32xf32, #tpu.memory_space<vmem>> -> memref<32xf32, #tpu.memory_space<vmem>>
        %62 = tpu.memref_slice %arg10[%57] : memref<8x!tpu.dma_semaphore, #tpu.memory_space<semaphore_mem>> -> memref<1x!tpu.dma_semaphore, #tpu.memory_space<semaphore_mem>>
        %63 = tpu.memref_squeeze %62 : memref<1x!tpu.dma_semaphore, #tpu.memory_space<semaphore_mem>> -> memref<!tpu.dma_semaphore, #tpu.memory_space<semaphore_mem>>
        tpu.wait_dma2 semaphore(%63 : memref<!tpu.dma_semaphore, #tpu.memory_space<semaphore_mem>>) src(%59 : memref<32xf32, #tpu.memory_space<any>>) dst(%61 : memref<32xf32, #tpu.memory_space<vmem>>)
      }
      %c8_i32_30 = arith.constant 8 : i32
      %c0_31 = arith.constant 0 : index
      %c0_32 = arith.constant 0 : index
      %49 = vector.load %arg5[%c0_31, %c0_32] : memref<8x32xf32, #tpu.memory_space<vmem>>, vector<8x32xf32>
      %c0_33 = arith.constant 0 : index
      %c0_34 = arith.constant 0 : index
      %50 = vector.load %arg9[%c0_33, %c0_34] : memref<8x32xf32, #tpu.memory_space<vmem>>, vector<8x32xf32>
      %51 = arith.subf %49, %50 : vector<8x32xf32>
      %52 = arith.mulf %51, %51 : vector<8x32xf32>
      %cst_35 = arith.constant dense<0.000000e+00> : vector<8xf32>
      %53 = vector.multi_reduction <add>, %52, %cst_35 [1] : vector<8x32xf32> to vector<8xf32>
      %54 = vector.shape_cast %53 : vector<8xf32> to vector<8x1xf32>
      %c0_36 = arith.constant 0 : index
      %c0_37 = arith.constant 0 : index
      %55 = vector.load %arg8[%c0_36, %c0_37] : memref<8x1xf32, #tpu.memory_space<vmem>>, vector<8x1xf32>
      tpu.vector_store %arg8[%c0_36, %c0_37], %54 {strides = array<i32>} : memref<8x1xf32, #tpu.memory_space<vmem>>, vector<8x1xf32>,
    } else {
    }
    return
  }
  func.func @transform_0(%arg0: i32, %arg1: i32, %arg2: memref<24xi32, #tpu.memory_space<smem>>) -> (i32, i32) {
    %c0_i32 = arith.constant 0 : i32
    %c0_i32_0 = arith.constant 0 : i32
    return %arg0, %c0_i32 : i32, i32
  }
  func.func @transform_1(%arg0: i32, %arg1: i32, %arg2: memref<24xi32, #tpu.memory_space<smem>>) -> (i32, i32) {
    %c0_i32 = arith.constant 0 : i32
    return %arg0, %arg1 : i32, i32
  }
  func.func @transform_2(%arg0: i32, %arg1: i32, %arg2: memref<24xi32, #tpu.memory_space<smem>>) -> (i32, i32) {
    %c0_i32 = arith.constant 0 : i32
    %c0_i32_0 = arith.constant 0 : i32
    return %arg0, %c0_i32 : i32, i32
  }
  func.func @transform_4(%arg0: i32, %arg1: i32, %arg2: memref<24xi32, #tpu.memory_space<smem>>) -> (i32, i32) {
    %c0_i32 = arith.constant 0 : i32
    %c0_i32_0 = arith.constant 0 : i32
    return %arg0, %c0_i32 : i32, i32
  }
  func.func @transform_5(%arg0: i32, %arg1: i32, %arg2: memref<24xi32, #tpu.memory_space<smem>>) -> (i32, i32) {
    %c0_i32 = arith.constant 0 : i32
    %c0_i32_0 = arith.constant 0 : i32
    return %arg0, %c0_i32 : i32, i32
  }
}

</mosaic_0001>

<bundles_post_ra>
// kernel: tpu_custom_call.1
= control target key start
LH: loop header
LB: loop body
LE: loop exit
PB: predicated region body
PF: predicated region fallthrough
CT: control target
= control target key end

     0   :  { %s763_s24 = smov [#allocation8]   ;;  %s914_s0 = inlined_call_operand.vmem [shape: s32[24], index: 0, kind: input, shape index: {}]   ;;  %s915_s1 = inlined_call_operand.vmem [shape: s32[24,1], index: 1, kind: input, shape index: {}]   ;;  %s916_s2 = inlined_call_operand.vmem [shape: f32[20,400], index: 2, kind: input, shape index: {}]   ;;  %s917_s3 = inlined_call_operand.vmem [shape: f32[20,32], index: 3, kind: input, shape index: {}]   ;;  %s918_s4 = inlined_call_operand.vmem [shape: f32[400,32], index: 4, kind: input, shape index: {}]   ;;  %s919_s5 = inlined_call_operand.vmem [shape: f32[24,1], index: 5, kind: output, shape index: {0}]   ;;  %s920_s6 = inlined_call_operand.vmem [shape: f32[24,1], index: 6, kind: output, shape index: {1}]  }
   0x1   :  { %s13_s23 = sshll.u32 %s914_s0, 4  ;;  %s14_s23 = int_to_ptr.vmem [resolvable:$true] %s13_s23 }
   0x2   :  { %16 = dma.vmem_to_smem %s14_s23, 16, %s763_s24, [#allocation7] }
   0x3   :  { %731 = dma.done.wait [#allocation7], 16 }
   0x4   :  { %732 = vsyncadd [#allocation7], 4294967280 }
   0x5   :  { %19 = sfence }
   0x6   :  { %s805_s25 = smov 0   ;;  %s807_s26 = smov 0  }
   0x7   :  { %s809_s27 = smov 0   ;;  %s811_s28 = smov 0  }
   0x8   :  { %s813_s29 = smov 0  }
   0x9 LB: > { %s34_s0 = sadd.s32 1, %s745_s27  ;;  %s37_s30 = sadd.s32 1, %s749_s28  ;;  %s753_s29 = sphi %s813_s29, %s25_s29   ;;  %s749_s28 = sphi %s811_s28, %s926_s28   ;;  %s745_s27 = sphi %s809_s27, %s925_s27   ;;  %s741_s26 = sphi %s807_s26, %s924_s26   ;;  %s737_s25 = sphi %s805_s25, %s923_s25  }
   0xa   : > { %p35_p0 = scmp.ge.s32.totalorder %s34_s0, 4  ;;  %p602_p1 = scmp.ge.s32.totalorder %s753_s29, 1 }
   0xb   : > { %p210_p2 = scmp.lt.s32.totalorder %s753_s29, 13 }
   0xc   : > { %s928_s0 = smov (%p35_p0, %s34_s0), 0  ;;  %s930_s30 = smov (!%p35_p0, %s37_s30), %s749_s28 }
   0xd   : > { %p211_p3 = pnand %p602_p1, %p210_p2  ;;  %p39_p4 = scmp.ge.s32.totalorder %s930_s30, 3 }
   0xe   : > { %p250_p5 = scmp.lt.s32.totalorder (!%p211_p3), %s741_s26, 2  ;;  %p256_p6 = scmp.lt.s32.totalorder (!%p211_p3), %s737_s25, 3 }
   0xf   : > { %s932_s30 = smov (%p39_p4, %s930_s30), 0  ;;  %214 = sbr.rel (%p211_p3) target bundleno = 570 (0x23a), region = 32 }
  0x10   : > { %921 = sst [smem:[#allocation12_spill]] %s932_s30  ;;  %p609_p7 = scmp.ne.s32.totalorder (!%p211_p3), %s737_s25, 0 }
  0x14   : > { %s251_s7 = scalar_select %p250_p5, %s741_s26, 2 }
  0x15   : > { %s257_s8 = scalar_select %p256_p6, %s737_s25, 3 }
  0x16   : > { %s843_s9 = sshll.u32 %s251_s7, 3  ;;  %s604_s10 = sshll.u32 %s251_s7, 2 }
  0x17   : > { %s253_s13 = scalar_lea.vmem %s915_s1, %s843_s9  ;;  %s259_s14 = sadd.s32 %s604_s10, %s257_s8 }
  0x18   : > { %s605_s15 = sshll.u32 %s259_s14, 3  ;;  %s265_s18 = scalar_lea.vmem %s917_s3, %s843_s9 }
  0x19   : > { %s856_s21 = scalar_lea.vmem %s916_s2, %s605_s15  ;;  %s269_s24 = scalar_lea.vmem %s919_s5, %s843_s9 }
  0x1a   : > { %s273_s11 = scalar_lea.vmem %s920_s6, %s843_s9  ;;  %277 = sbr.rel (%p609_p7) target bundleno = 50 (0x32), region = 36 }
  0x1b   : > { %s755_s8 = smov (!%p609_p7), 0  }
  0x1f LB: >> { %s610_s10 = sshll.u32 %s741_s26, 3  ;;  %s288_s19 = scalar_lea.vmem [#allocation2], %s757_s8  ;;  %s757_s8 = sphi %s755_s8, %s283_s8  }
  0x20   : >> { %s285_s12 = sadd.s32 %s757_s8, %s610_s10  ;;  %s289_s30 = scalar_lea.sflag [#allocation3], %s757_s8 }
  0x21   : >> { %s286_s14 = sld [smem:[#allocation8 + %s285_s12]] }
  0x27   : >> { %s287_s17 = scalar_lea.vmem %s918_s4, %s286_s14 }
  0x28   : >> { %v304_v0 = vld [vmem:[%s287_s17] sm:$0x1] }
  0x29   : >> { %305 = vst [vmem:[%s288_s19] sm:$0x1] %v304_v0 }
  0x2a   : >> { %323 = vsyncadd %s289_s30, 16  ;;  %s283_s8 = sadd.s32 1, %s757_s8  }
  0x2b   : >> { %p280_p8 = scmp.ge.s32.totalorder %s283_s8, 8  }
  0x2c   : > { %vm324_vm0 = vcmask (%p280_p8), 7168   ;;  %v764_v1 = vmov (%p280_p8), -inf   ;;  %v765_v2 = vmov (%p280_p8), 0.0  }
  0x2d   : > { %282 = sbr.rel (!%p280_p8) target bundleno = 31 (0x1f), region = 147  ;;  %325 = vst.msk [vmem:[#allocation4] sm:$0xff] (%p280_p8), %vm324_vm0, %v764_v1 }
  0x2e   : > { %326 = vst.msk [vmem:[#allocation5] sm:$0xff] (%p280_p8), %vm324_vm0, %v765_v2 }
  0x2f   : > { %327 = vst.msk [vmem:[#allocation6] sm:$0xff] (%p280_p8), %vm324_vm0, %v765_v2 }
  0x32 PF: > { %v330_v3 = vlaneseq  ;;  %s611_s20 = sshll.u32 %s737_s25, 7  ;;  %v328_v6 = vld [vmem:[%s856_s21] sm:$0xff]  ;;  %v766_v9 = vmov 0   ;;  %vm357_vm2 = vcmask 7168   ;;  %p612_p9 = scmp.ne.s32.totalorder %s737_s25, 3 }
  0x33   : > { %v333_v4 = vstv %s611_s20  ;;  %683 = vset.pattern.permute.xlu0 %v766_v9  ;;  %684 = vset.pattern.permute.xlu1 %v766_v9  ;;  %v329_v10 = vld [vmem:[%s253_s13] sm:$0xff]  ;;  %s759_s23 = smov (!%p612_p9), 0  }
  0x34   : > { %v331_v5 = vand.u32 127, %v330_v3  ;;  %362 = vperm.xlu1 %684, %v329_v10   ;;  %v337_v11 = vld [vmem:[#allocation4] sm:$0xff] }
  0x35   : > { %v341_v26 = vld [vmem:[#allocation5] sm:$0xff] }
  0x36   : > { %v334_v7 = vadd.s32 %v333_v4, %v331_v5  ;;  %v360_v21 = vld [vmem:[#allocation6] sm:$0xff] }
  0x38   : > { %vm335_vm1 = vcmp.lt.s32.totalorder %v334_v7, 400 }
  0x39   : > { %v336_v8 = vsel %vm335_vm1, %v328_v6, -inf }
  0x3a   : > { %338 = vmax.xlane.f32.xlu0 %v336_v8 }
  0xa6   : > { %v363_v15 = vpop.permute.xlu1 %362 }
  0xa7   : > { %vm364_vm3 = vcmp.eq.s32.totalorder %v334_v7, %v363_v15 }
  0xa8   : > { %v365_v16 = vsel %vm364_vm3, %v328_v6, 0.0 }
  0xa9   : > { %366 = vadd.xlane.f32.xlu2 %v365_v16 }
  0xad   : > { %v339_v12 = vpop.xlane.xlu0 %338 }
  0xae   : > { %v340_v13 = vmax.f32 %v337_v11, %v339_v12 }
  0xb0   : > { %v342_v14 = vsub.f32 %v337_v11, %v340_v13  ;;  %359 = vst.msk [vmem:[#allocation4] sm:$0xff] %vm357_vm2, %v340_v13  ;;  %348 = vperm.xlu0 %683, %v340_v13  }
  0xb2   : > { %v343_v24 = vmul.f32 1.442695, %v342_v14 }
 0x11c   : > { %v367_v22 = vpop.xlane.xlu2 %366 }
 0x11d   : > { %v368_v23 = vadd.f32 %v367_v22, %v360_v21 }
 0x11f   : > { %369 = vst.msk [vmem:[#allocation6] sm:$0xff] %vm357_vm2, %v368_v23 }
 0x122   : > { %v349_v17 = vpop.permute.xlu0 %348 }
 0x123   : > { %v351_v18 = vsub.f32 %v336_v8, %v349_v17 }
 0x125   : > { %v352_v19 = vmul.f32 1.442695, %v351_v18 }
 0x127   : > { %685 = vpow2.f32 %v352_v19 }
 0x128   : > { %687 = vpow2.f32 %v343_v24 }
 0x12d   : > { %v686_v20 = vpop.eup %685 }
 0x12e   : > { %354 = vadd.xlane.f32.xlu1 %v686_v20  ;;  %v688_v25 = vpop.eup %687 }
 0x12f   : > { %v345_v27 = vmul.f32 %v688_v25, %v341_v26 }
 0x1a0   : > { %373 = sbr.rel (%p612_p9) target bundleno = 570 (0x23a), region = 77 }
 0x1a1   : > { %v355_v28 = vpop.xlane.xlu1 %354 }
 0x1a2   : > { %v356_v29 = vadd.f32 %v355_v28, %v345_v27 }
 0x1a4   : > { %358 = vst.msk [vmem:[#allocation5] sm:$0xff] %vm357_vm2, %v356_v29 }
 0x1a5   : > { %v374_v32 = vld [vmem:[#allocation4] sm:$0xff]  ;;  %v379_v34 = vld [vmem:[#allocation6] sm:$0xff] }
 0x1ab   : > { %v375_v30 = vld [vmem:[#allocation5] sm:$0xff] }
 0x1ac   : > { %689 = vlog2.f32 %v375_v30 }
 0x1b2   : > { %v690_v31 = vpop.eup %689 }
 0x1b3   : > { %v377_v33 = vmul.f32 0.6931472, %v690_v31 }
 0x1b5   : > { %v378_v35 = vadd.f32 %v377_v33, %v374_v32 }
 0x1b7   : > { %v380_v36 = vsub.f32 %v378_v35, %v379_v34 }
 0x1b9   : > { %381 = vst.msk [vmem:[%s269_s24] sm:$0xff] %vm357_vm2, %v380_v36 }
 0x1ba LB: >> { %s388_s25 = scalar_lea.sflag [#allocation3], %s761_s23  ;;  %s761_s23 = sphi %s759_s23, %s387_s23  }
 0x1bb   : >> { %733 = dma.done.wait %s388_s25, 16 }
 0x1bc   : >> { %734 = vsyncadd %s388_s25, 4294967280  ;;  %s387_s23 = sadd.s32 1, %s761_s23  }
 0x1bd   : >> { %p384_p10 = scmp.ge.s32.totalorder %s387_s23, 8  }
 0x1be   : > { %v391_v37 = vld [vmem:[%s265_s18] sm:$0xff] (%p384_p10)  ;;  %vm395_vm4 = vcmask (%p384_p10), 261120  }
 0x1bf   : > { %386 = sbr.rel (!%p384_p10) target bundleno = 442 (0x1ba), region = 158  ;;  %v392_v38 = vld [vmem:[#allocation2] sm:$0xff] (%p384_p10) }
 0x1c0   : > { %v393_v39 = vsub.f32 (%p384_p10), %v391_v37, %v392_v38 }
 0x1c2   : > { %v394_v40 = vmul.f32 (%p384_p10), %v393_v39, %v393_v39 }
 0x1c4   : > { %v396_v41 = vsel %vm395_vm4, %v394_v40, 0.0 }
 0x1c5   : > { %397 = vadd.xlane.f32.xlu0 %v396_v41 }
 0x238   : > { %v398_v42 = vpop.xlane.xlu0 %397 }
 0x239   : > { %399 = vst.msk [vmem:[%s273_s11] sm:$0xff] %vm357_vm2, %v398_v42 }
 0x23a PF: > { %s25_s29 = sadd.s32 1, %s753_s29   ;;  %s922_s18 = sld [smem:[#allocation12_spill]] }
 0x23b   : > { %p22_p11 = scmp.ge.s32.totalorder %s25_s29, 14   ;;  %s923_s25 = smov %s745_s27 }
 0x23c   : > { %s924_s26 = smov %s749_s28  ;;  %s925_s27 = smov %s928_s0 }
 0x23d   :  { %24 = sbr.rel (!%p22_p11) target bundleno = 9 (0x9), region = 169 }
 0x240   : > { %s926_s28 = smov %s922_s18 }
 0x242   :  { %433 = vsyncmov [#allocation3] }
 0x245   :  { %s434_s9 = vpop.sfrf %433 }
 0x246   :  { %p615_p12 = scmp.ne.s32.totalorder %s434_s9, 0 }
 0x248   :  { %438 = shalt.err (%p615_p12)  }
 0x249   :  { %440 = vsyncmov [#allocation3 + $0x1] }
 0x24c   :  { %s441_s11 = vpop.sfrf %440 }
 0x24d   :  { %p616_p13 = scmp.ne.s32.totalorder %s441_s11, 0 }
 0x24f   :  { %445 = shalt.err (%p616_p13)  }
 0x250   :  { %447 = vsyncmov [#allocation3 + $0x2] }
 0x253   :  { %s448_s12 = vpop.sfrf %447 }
 0x254   :  { %p617_p0 = scmp.ne.s32.totalorder %s448_s12, 0 }
 0x256   :  { %452 = shalt.err (%p617_p0)  }
 0x257   :  { %454 = vsyncmov [#allocation3 + $0x3] }
 0x25a   :  { %s455_s14 = vpop.sfrf %454 }
 0x25b   :  { %p618_p1 = scmp.ne.s32.totalorder %s455_s14, 0 }
 0x25d   :  { %459 = shalt.err (%p618_p1)  }
 0x25e   :  { %461 = vsyncmov [#allocation3 + $0x4] }
 0x261   :  { %s462_s0 = vpop.sfrf %461 }
 0x262   :  { %p619_p2 = scmp.ne.s32.totalorder %s462_s0, 0 }
 0x264   :  { %466 = shalt.err (%p619_p2)  }
 0x265   :  { %468 = vsyncmov [#allocation3 + $0x5] }
 0x268   :  { %s469_s1 = vpop.sfrf %468 }
 0x269   :  { %p620_p3 = scmp.ne.s32.totalorder %s469_s1, 0 }
 0x26b   :  { %473 = shalt.err (%p620_p3)  }
 0x26c   :  { %475 = vsyncmov [#allocation3 + $0x6] }
 0x26f   :  { %s476_s2 = vpop.sfrf %475 }
 0x270   :  { %p621_p4 = scmp.ne.s32.totalorder %s476_s2, 0 }
 0x272   :  { %480 = shalt.err (%p621_p4)  }
 0x273   :  { %482 = vsyncmov [#allocation3 + $0x7] }
 0x276   :  { %s483_s3 = vpop.sfrf %482 }
 0x277   :  { %p622_p5 = scmp.ne.s32.totalorder %s483_s3, 0 }
 0x279   :  { %487 = shalt.err (%p622_p5)  }

</bundles_post_ra>
